<compile_context>
chip_gen: v5e
topology: v5e:2x2
jax: 0.10.0
libtpu: 0.0.40
codegen_flags: <defaults>
</compile_context>

<pallas_src>
import functools

import jax
import jax.numpy as jnp
from jax.experimental import pallas as pl
from jax.experimental.pallas import tpu as pltpu


# ----------------------------- Pallas kernel --------------------------------


def _round_up(x, m):
    return (x + m - 1) // m * m


def _matmul_kernel(a_ref, b_ref, bias_ref, o_ref, acc_ref, *, apply_relu):
    """Tiled o = a @ b (+ bias, optional ReLU); f32 accumulation in VMEM scratch."""
    k = pl.program_id(2)

    @pl.when(k == 0)
    def _():
        acc_ref[...] = jnp.zeros_like(acc_ref)

    acc_ref[...] += jnp.dot(
        a_ref[...], b_ref[...], preferred_element_type=jnp.float32
    )

    @pl.when(k == pl.num_programs(2) - 1)
    def _():
        out = acc_ref[...] + bias_ref[...]  # f32 epilogue; bias is (1, tn)
        if apply_relu:
            out = jnp.maximum(out, 0.0)
        o_ref[...] = out.astype(o_ref.dtype)


def matmul_bias_act(
    a,
    b,
    bias=None,
    *,
    apply_relu=False,
    out_dtype=jnp.float32,
    compute_dtype=jnp.bfloat16,
    tile_m=256,
    tile_n=256,
    tile_k=256,
):
    """Tiled Pallas matmul with fused bias + optional ReLU epilogue.

    Inputs are zero-padded so every tile is (8,128)-aligned; the output's last
    dim tile is >=128 (lane-dense stores). Padded rows/cols are zero, so they
    do not affect the valid region, which is sliced back out at the end.
    """
    M, K = a.shape
    Kb, N = b.shape
    assert K == Kb, (a.shape, b.shape)

    tm = min(tile_m, _round_up(M, 8))     # sublane dim
    tn = min(tile_n, _round_up(N, 128))   # lane-dense output (>= 128)
    tk = min(tile_k, _round_up(K, 128))   # 256-multiples where K allows (v6e/v7x MXU)

    Mp, Kp, Np = _round_up(M, tm), _round_up(K, tk), _round_up(N, tn)

    a_p = jnp.pad(a, ((0, Mp - M), (0, Kp - K))).astype(compute_dtype)
    b_p = jnp.pad(b, ((0, Kp - K), (0, Np - N))).astype(compute_dtype)
    if bias is None:
        bias_p = jnp.zeros((1, Np), jnp.float32)
    else:
        bias_p = jnp.pad(bias.astype(jnp.float32), (0, Np - N)).reshape(1, Np)

    grid = (Mp // tm, Np // tn, Kp // tk)
    kern = functools.partial(_matmul_kernel, apply_relu=apply_relu)

    in_bytes = (Mp * Kp + Kp * Np) * jnp.dtype(compute_dtype).itemsize
    out_bytes = Mp * Np * jnp.dtype(out_dtype).itemsize

    out_p = pl.pallas_call(
        kern,
        out_shape=jax.ShapeDtypeStruct((Mp, Np), out_dtype),
        grid_spec=pltpu.PrefetchScalarGridSpec(
            num_scalar_prefetch=0,
            grid=grid,
            in_specs=[
                pl.BlockSpec((tm, tk), lambda i, j, k: (i, k)),   # a
                pl.BlockSpec((tk, tn), lambda i, j, k: (k, j)),   # b
                pl.BlockSpec((1, tn), lambda i, j, k: (0, j)),    # bias
            ],
            out_specs=pl.BlockSpec((tm, tn), lambda i, j, k: (i, j)),
            scratch_shapes=[pltpu.VMEM((tm, tn), jnp.float32)],
        ),
        compiler_params=pltpu.CompilerParams(
            dimension_semantics=("parallel", "parallel", "arbitrary"),
            vmem_limit_bytes=32 * 1024 * 1024,   # explicit, fits all TPU gens
        ),
        cost_estimate=pl.CostEstimate(
            flops=2 * Mp * Np * Kp,
            transcendentals=0,
            bytes_accessed=in_bytes + out_bytes,
        ),
    )(a_p, b_p, bias_p)

    return out_p[:M, :N]


def gcn_layer(a_hat, x, w, b, *, apply_relu, out_dtype):
    """One GCN layer: A_hat @ (X @ W) + b (optional ReLU), two tiled Pallas matmuls."""
    # Feature transform hoisted out of the aggregation loop; Z kept in bf16.
    z = matmul_bias_act(x, w, bias=None, apply_relu=False, out_dtype=jnp.bfloat16)
    # Memory-bound aggregation over the (bf16) normalized adjacency.
    return matmul_bias_act(a_hat, z, bias=b, apply_relu=apply_relu, out_dtype=out_dtype)


# ------------------------------ JAX glue -------------------------------------


def normalized_adjacency(edge_index, num_nodes):
    """Dense D^{-1/2} (A + I) D^{-1/2}, matching PyG gcn_norm semantics.

    Edge (src -> dst) contributes to row dst / column src; duplicate edges
    accumulate; a self-loop of weight 1 is added to every node; no implicit
    symmetrization (matches GCNConv on a directed edge_index).
    """
    src, dst = edge_index[0], edge_index[1]
    a = jnp.zeros((num_nodes, num_nodes), jnp.float32)
    a = a.at[dst, src].add(1.0)
    a = a + jnp.eye(num_nodes, dtype=jnp.float32)
    deg = a.sum(axis=1)
    d_inv_sqrt = jnp.where(deg > 0, 1.0 / jnp.sqrt(deg), 0.0)
    return d_inv_sqrt[:, None] * a * d_inv_sqrt[None, :]


def encoder_forward(x, edge_index, params, *, training=False, dropout=0.5):
    """Forward pass of Encoder: relu(GCN1) -> dropout -> GCN2."""
    n = x.shape[0]
    # Build A_hat once, store in bf16 (halves HBM traffic / VMEM footprint);
    # it is reused by both layers.
    a_hat = normalized_adjacency(edge_index, n).astype(jnp.bfloat16)

    h = gcn_layer(
        a_hat, x, params["w1"], params["b1"], apply_relu=True, out_dtype=jnp.bfloat16
    )
    # TODO(synk): training-mode dropout (pltpu.prng_seed + prng_random_bits);
    # eval mode (training=False) makes dropout the identity, matching F.dropout.
    del training, dropout
    out = gcn_layer(
        a_hat, h, params["w2"], params["b2"], apply_relu=False, out_dtype=jnp.float32
    )
    return out


def init_params(key, in_channels, hidden_channels, out_channels):
    """Deterministic glorot-uniform weights + zero biases (GCNConv defaults)."""
    k1, k2 = jax.random.split(key)

    def glorot(k, fan_in, fan_out):
        limit = jnp.sqrt(6.0 / (fan_in + fan_out))
        return jax.random.uniform(
            k, (fan_in, fan_out), jnp.float32, minval=-limit, maxval=limit
        )

    return {
        "w1": glorot(k1, in_channels, hidden_channels),
        "b1": jnp.zeros((hidden_channels,), jnp.float32),
        "w2": glorot(k2, hidden_channels, out_channels),
        "b2": jnp.zeros((out_channels,), jnp.float32),
    }


# --------------------------------- main ---------------------------------------


if __name__ == "__main__":
    key = jax.random.PRNGKey(0)
    k_x, k_e, k_p = jax.random.split(key, 3)

    num_nodes = 512
    in_channels = 64
    hidden_channels = 128
    out_channels = 64
    num_edges = 2048

    x = jax.random.normal(k_x, (num_nodes, in_channels), jnp.float32)
    edge_index = jax.random.randint(k_e, (2, num_edges), 0, num_nodes, jnp.int32)
    params = init_params(k_p, in_channels, hidden_channels, out_channels)

    out = encoder_forward(x, edge_index, params, training=False)
    jax.block_until_ready(out)

    assert out.shape == (num_nodes, out_channels), out.shape
    assert out.dtype == jnp.float32, out.dtype
    print("KERNEL_OK")
</pallas_src>

<mosaic_0001>
module attributes {stable_mosaic.version = 11 : i64} {
  func.func @_matmul_kernel(%arg0: i32, %arg1: i32, %arg2: i32, %arg3: memref<256x128xbf16, #tpu.memory_space<vmem>>, %arg4: memref<128x128xbf16, #tpu.memory_space<vmem>>, %arg5: memref<1x128xf32, #tpu.memory_space<vmem>>, %arg6: memref<256x128xbf16, #tpu.memory_space<vmem>>, %arg7: memref<256x128xf32, #tpu.memory_space<vmem>>) attributes {dimension_semantics = [#tpu.dimension_semantics<parallel>, #tpu.dimension_semantics<parallel>, #tpu.dimension_semantics<arbitrary>], iteration_bounds = array<i64: 2, 1, 1>, scalar_prefetch = 0 : i64, scratch_operands = 1 : i64, tpu.core_type = #tpu.core_type<tc>, window_params = [{transform_indices = @transform_0, window_bounds = array<i64: 256, 128>}, {transform_indices = @transform_1, window_bounds = array<i64: 128, 128>}, {transform_indices = @transform_2, window_bounds = array<i64: 1, 128>}, {transform_indices = @transform_3, window_bounds = array<i64: 256, 128>}]} {
    %c0_i32 = arith.constant 0 : i32
    %0 = arith.cmpi eq, %arg2, %c0_i32 : i32
    %1 = arith.extui %0 : i1 to i32
    %c0_i32_0 = arith.constant 0 : i32
    %2 = arith.cmpi ne, %1, %c0_i32_0 : i32
    scf.if %2 {
      %cst_10 = arith.constant 0.000000e+00 : f32
      %12 = vector.broadcast %cst_10 : f32 to vector<256x128xf32>
      %c0_11 = arith.constant 0 : index
      %c0_12 = arith.constant 0 : index
      %13 = vector.load %arg7[%c0_11, %c0_12] : memref<256x128xf32, #tpu.memory_space<vmem>>, vector<256x128xf32>
      tpu.vector_store %arg7[%c0_11, %c0_12], %12 {strides = array<i32>} : memref<256x128xf32, #tpu.memory_space<vmem>>, vector<256x128xf32>,
    } else {
    }
    %c0 = arith.constant 0 : index
    %c0_1 = arith.constant 0 : index
    %3 = vector.load %arg7[%c0, %c0_1] : memref<256x128xf32, #tpu.memory_space<vmem>>, vector<256x128xf32>
    %c0_2 = arith.constant 0 : index
    %c0_3 = arith.constant 0 : index
    %4 = vector.load %arg3[%c0_2, %c0_3] : memref<256x128xbf16, #tpu.memory_space<vmem>>, vector<256x128xbf16>
    %c0_4 = arith.constant 0 : index
    %c0_5 = arith.constant 0 : index
    %5 = vector.load %arg4[%c0_4, %c0_5] : memref<128x128xbf16, #tpu.memory_space<vmem>>, vector<128x128xbf16>
    %cst = arith.constant dense<0.000000e+00> : vector<256x128xf32>
    %6 = tpu.matmul %4, %5, %cst {dimension_numbers = #tpu.dot_dimension_numbers<[1], [0], [0], [1], [0, 0, 1, 1], [], []>} : vector<256x128xbf16>, vector<128x128xbf16>, vector<256x128xf32> -> vector<256x128xf32>
    %7 = arith.addf %3, %6 : vector<256x128xf32>
    %c0_6 = arith.constant 0 : index
    %c0_7 = arith.constant 0 : index
    %8 = vector.load %arg7[%c0_6, %c0_7] : memref<256x128xf32, #tpu.memory_space<vmem>>, vector<256x128xf32>
    tpu.vector_store %arg7[%c0_6, %c0_7], %7 {strides = array<i32>} : memref<256x128xf32, #tpu.memory_space<vmem>>, vector<256x128xf32>,
    %c0_i32_8 = arith.constant 0 : i32
    %9 = arith.cmpi eq, %arg2, %c0_i32_8 : i32
    %10 = arith.extui %9 : i1 to i32
    %c0_i32_9 = arith.constant 0 : i32
    %11 = arith.cmpi ne, %10, %c0_i32_9 : i32
    scf.if %11 {
      %c0_10 = arith.constant 0 : index
      %c0_11 = arith.constant 0 : index
      %12 = vector.load %arg7[%c0_10, %c0_11] : memref<256x128xf32, #tpu.memory_space<vmem>>, vector<256x128xf32>
      %c0_12 = arith.constant 0 : index
      %c0_13 = arith.constant 0 : index
      %13 = vector.load %arg5[%c0_12, %c0_13] : memref<1x128xf32, #tpu.memory_space<vmem>>, vector<1x128xf32>
      %14 = vector.broadcast %13 : vector<1x128xf32> to vector<256x128xf32>
      %15 = arith.addf %12, %14 : vector<256x128xf32>
      %16 = arith.truncf %15 : vector<256x128xf32> to vector<256x128xbf16>
      %c0_14 = arith.constant 0 : index
      %c0_15 = arith.constant 0 : index
      %17 = vector.load %arg6[%c0_14, %c0_15] : memref<256x128xbf16, #tpu.memory_space<vmem>>, vector<256x128xbf16>
      tpu.vector_store %arg6[%c0_14, %c0_15], %16 {strides = array<i32>} : memref<256x128xbf16, #tpu.memory_space<vmem>>, vector<256x128xbf16>,
    } else {
    }
    return
  }
  func.func @transform_0(%arg0: i32, %arg1: i32, %arg2: i32) -> (i32, i32) {
    %c0_i32 = arith.constant 0 : i32
    return %arg0, %arg2 : i32, i32
  }
  func.func @transform_1(%arg0: i32, %arg1: i32, %arg2: i32) -> (i32, i32) {
    %c0_i32 = arith.constant 0 : i32
    return %arg2, %arg1 : i32, i32
  }
  func.func @transform_2(%arg0: i32, %arg1: i32, %arg2: i32) -> (i32, i32) {
    %c0_i32 = arith.constant 0 : i32
    %c0_i32_0 = arith.constant 0 : i32
    return %c0_i32, %arg1 : i32, i32
  }
  func.func @transform_3(%arg0: i32, %arg1: i32, %arg2: i32) -> (i32, i32) {
    %c0_i32 = arith.constant 0 : i32
    return %arg0, %arg1 : i32, i32
  }
}

</mosaic_0001>

<bundles_post_ra>
// kernel: tpu_custom_call.1
= control target key start
LH: loop header
LB: loop body
LE: loop exit
PB: predicated region body
PF: predicated region fallthrough
CT: control target
= control target key end

     0   :  { %s1682_s0 = inlined_call_operand.hbm [shape: bf16[512,128], index: 0, kind: input, shape index: {}]   ;;  %s1683_s1 = inlined_call_operand.hbm [shape: bf16[128,128], index: 1, kind: input, shape index: {}]   ;;  %s1684_s2 = inlined_call_operand.vmem [shape: f32[1,128], index: 2, kind: input, shape index: {}]   ;;  %s1685_s3 = inlined_call_operand.hbm [shape: bf16[512,128], index: 3, kind: output, shape index: {}]  }
   0x1   :  { %1687 = sst [smem:[#allocation12_spill]] %s1683_s1 }
   0x2   :  { %8 = vsyncpa [#allocation4], 0 }
   0x3   :  { %10 = vsyncpa [#allocation4 + $0x1], 0 }
   0x4   :  { %11 = vsyncpa [#allocation7], 0 }
   0x5   :  { %12 = vsyncpa [#allocation5], 0 }
   0x6   :  { %14 = vsyncpa [#allocation5 + $0x1], 0  ;;  %s1449_s12 = smov 0   ;;  %s1451_s13 = smov 0  }
   0x7   :  { %s1453_s14 = smov 0   ;;  %s1455_s15 = smov 0  }
   0x8   :  { %s1457_s16 = smov 0   ;;  %s1459_s17 = smov 0  }
   0x9 LB: > { %s939_s18 = sadd.s32 4294967295, %s1422_s17   ;;  %s940_s19 = sadd.s32 4294967294, %s1422_s17   ;;  %s1422_s17 = sphi %s1459_s17, %s20_s17   ;;  %s1418_s16 = sphi %s1457_s16, %s1701_s16   ;;  %s1414_s15 = sphi %s1455_s15, %s1700_s15   ;;  %s1410_s14 = sphi %s1453_s14, %s1699_s14   ;;  %s1406_s13 = sphi %s1451_s13, %s1698_s13   ;;  %s1402_s12 = sphi %s1449_s12, %s1697_s12  }
   0xa   : > { %p61_p0 = scmp.ne.s32.totalorder %s1406_s13, %s1402_s12  ;;  %p1483_p1 = scmp.eq.s32.totalorder %s939_s18, 0 }
   0xb   : > { %p1487_p2 = scmp.eq.s32.totalorder %s939_s18, 1  ;;  %p147_p3 = scmp.eq.s32.totalorder %s940_s19, 1 }
   0xc   : > { %p1493_p4 = por %p1483_p1, %p61_p0  ;;  %p941_p5 = scmp.ge.s32.totalorder %s1422_s17, 1 }
   0xd   : > { %p1498_p6 = por %p147_p3, %p61_p0  ;;  %p154_p7 = scmp.lt.s32.totalorder %s1422_s17, 3 }
   0xe   : > { %s1692_s1 = sld [smem:[#allocation12_spill]]  ;;  %s1424_s28 = smov [#allocation6]  }
   0xf   : > { %p1506_p8 = pnand %p941_p5, %p154_p7  ;;  %s171_s29 = sshll.u32 %s1424_s28, 4  ;;  %s172_s29 = int_to_ptr.vmem [resolvable:$true] %s171_s29 }
  0x10   : > { %p944_p11 = scmp.ge.s32.totalorder %s1422_s17, 2  ;;  %s1686_s30 = smov 64  }
  0x11   : > { %p1206_p9 = pneg %p1506_p8  ;;  %s1426_s4 = smov 4  }
  0x12   : > { %s39_s5 = sadd.s32 1, %s1418_s16  ;;  %s48_s6 = sadd.s32 1, %s1410_s14 }
  0x13   : > { %p1207_p10 = pnand %p1206_p9, %p1483_p1  ;;  %p41_p12 = scmp.ge.s32.totalorder %s39_s5, 2 }
  0x14   : > { %s169_s26 = sshll.u32 %s1692_s1, 4  ;;  %p55_p13 = scmp.ne.s32.totalorder %s1410_s14, %s1406_s13  ;;  %s170_s26 = int_to_ptr.hbm [resolvable:$true] %s169_s26 }
  0x15   : > { %1209 = dma.hbm_to_vmem [thread:$0]  (!%p1207_p10), %s170_s26, 1024, %s172_s29, [#allocation7], %s1686_s30, %s1686_s30, %s1426_s4  }
  0x16   : > { %p56_p0 = scmp.eq.s32.totalorder %s1422_s17, 0  ;;  %s1703_s5 = smov (%p41_p12, %s39_s5), 0 }
  0x17   : > { %p1531_p5 = por %p1487_p2, %p55_p13  ;;  %s43_s9 = ssub.s32 %s1418_s16, %s1703_s5 }
  0x18   : > { %p1525_p3 = por %p56_p0, %p55_p13  ;;  %p1219_p7 = scmp.lt.s32.totalorder %s1422_s17, 2 }
  0x19   : > { %p46_p9 = scmp.eq.s32.totalorder %s43_s9, 0  ;;  %s191_s10 = sand.u32 1, %s1410_s14  }
  0x1a   : > { %s945_s11 = sshll.u32 %s191_s10, 7  ;;  %s1053_s19 = sshll.u32 %s1418_s16, 7 }
  0x1b   : > { %s1540_s18 = scalar_select %p46_p9, %s1410_s14, %s48_s6  }
  0x1c   : > { %s201_s26 = scalar_lea.hbm %s1682_s0, %s1053_s19  ;;  %s195_s28 = scalar_lea.vmem [#allocation3], %s945_s11 }
  0x1d   : > { %s204_s29 = sshll.u32 %s195_s28, 4  ;;  %s202_s21 = sshll.u32 %s201_s26, 4  ;;  %s205_s29 = int_to_ptr.vmem [resolvable:$true] %s204_s29  ;;  %s203_s21 = int_to_ptr.hbm [resolvable:$true] %s202_s21 }
  0x1e   : > { %p1211_p2 = pnand %p1219_p7, %p1525_p3  ;;  %s192_s30 = scalar_lea.sflag [#allocation4], %s191_s10 }
  0x1f   : > { %s1696_s1 = smov 64   ;;  %216 = sbr.rel (%p1506_p8) target bundleno = 269 (0x10d), region = 32 }
  0x20   : > { %1213 = dma.hbm_to_vmem [thread:$0]  (!%p1211_p2), %s203_s21, 2048, %s205_s29, %s192_s30, %s1696_s1, %s1696_s1, %s1426_s4  }
  0x21   : > { %s1554_s6 = sand.u32 (!%p1506_p8), 1, %s1406_s13  }
  0x22   : > { %s949_s9 = sshll.u32 (!%p1506_p8), %s1554_s6, 7  ;;  %s219_s11 = scalar_lea.sflag (!%p1506_p8), [#allocation4], %s1554_s6 }
  0x23   : > { %s1560_s7 = scalar_lea.vmem (!%p1506_p8), [#allocation3], %s949_s9 }
  0x24   : > { %1389 = dma.done.wait (%p1493_p4), %s219_s11, 2048  }
  0x25   : > { %1391 = vsyncadd (%p1493_p4), %s219_s11, 4294965248 }
  0x26   : > { %1393 = dma.done.wait (%p1483_p1), [#allocation7], 1024  }
  0x27   : > { %1395 = vsyncadd (%p1483_p1), [#allocation7], 4294966272  ;;  %v1077_v0 = vld [vmem:[#allocation6 + $0x38] sm:$0xff]  ;;  %v1076_v1 = vld [vmem:[#allocation6 + $0x30] sm:$0xff]  ;;  %s1597_s22 = scalar_lea.vmem [#allocation8], %s949_s9  ;;  %s1078_s27 = sshll.u32 %s1414_s15, 7 }
  0x28   : > { %520 = vmatpush.bf16.msra.mxu0 %v1077_v0  ;;  %1174 = vmatpush.bf16.msra.mxu1 %v1077_v0  ;;  %v1075_v2 = vld [vmem:[#allocation6 + $0x28] sm:$0xff]  ;;  %v1074_v3 = vld [vmem:[#allocation6 + $0x20] sm:$0xff]  ;;  %v1073_v4 = vld [vmem:[#allocation6 + $0x18] sm:$0xff]  ;;  %s821_s10 = scalar_lea.hbm %s1685_s3, %s1078_s27  ;;  %s822_s19 = sshll.u32 %s1597_s22, 4  ;;  %s823_s19 = int_to_ptr.vmem [resolvable:$true] %s822_s19 }
  0x29   : > { %1175 = vmatpush.bf16.msra.mxu2 %v1077_v0  ;;  %1176 = vmatpush.bf16.msra.mxu3 %v1077_v0  ;;  %v1072_v5 = vld [vmem:[#allocation6 + $0x10] sm:$0xff]  ;;  %v1071_v6 = vld [vmem:[#allocation6 + $0x8] sm:$0xff]  ;;  %v1070_v7 = vld [vmem:[#allocation6] sm:$0xff]  ;;  %s824_s24 = sshll.u32 %s821_s10, 4  ;;  %s809_s15 = scalar_lea.sflag [#allocation5], %s1554_s6  ;;  %s825_s24 = int_to_ptr.hbm [resolvable:$true] %s824_s24 }
  0x2a   : > { %v1054_v8 = vld [vmem:[%s1560_s7] sm:$0xff]  ;;  %v1055_v12 = vld [vmem:[%s1560_s7 + $0x8] sm:$0xff]  ;;  %v1056_v16 = vld [vmem:[%s1560_s7 + $0x10] sm:$0xff]  ;;  %s1350_s25 = sshra.s32 %s825_s24, 4  ;;  %s1356_s21 = scalar_lea.hbm %s1685_s3, 256  ;;  %s1351_s25 = int_to_ptr.hbm [resolvable:$true] %s1350_s25 }
  0x2b   : > { %v1058_v9 = vld [vmem:[%s1560_s7 + $0x20] sm:$0xff]  ;;  %v1059_v13 = vld [vmem:[%s1560_s7 + $0x28] sm:$0xff]  ;;  %v1060_v17 = vld [vmem:[%s1560_s7 + $0x30] sm:$0xff]  ;;  %s1352_s26 = scalar_lea.hbm %s1351_s25, 128  ;;  %p1357_p10 = scmp.lt.s32.totalorder %s1351_s25, %s1685_s3 }
  0x2c   : > { %521 = vmatpush.bf16.msra.mxu0 %v1076_v1  ;;  %1177 = vmatpush.bf16.msra.mxu1 %v1076_v1  ;;  %v1062_v10 = vld [vmem:[%s1560_s7 + $0x40] sm:$0xff]  ;;  %v1063_v14 = vld [vmem:[%s1560_s7 + $0x48] sm:$0xff]  ;;  %v1064_v18 = vld [vmem:[%s1560_s7 + $0x50] sm:$0xff]  ;;  %p1353_p1 = scmp.ne.s32.totalorder %s1351_s25, %s1352_s26  ;;  %p1358_p12 = scmp.lt.s32.totalorder %s1356_s21, %s1352_s26 }
  0x2d   : > { %1178 = vmatpush.bf16.msra.mxu2 %v1076_v1  ;;  %1179 = vmatpush.bf16.msra.mxu3 %v1076_v1  ;;  %v1066_v11 = vld [vmem:[%s1560_s7 + $0x60] sm:$0xff]  ;;  %v1067_v15 = vld [vmem:[%s1560_s7 + $0x68] sm:$0xff]  ;;  %v1068_v19 = vld [vmem:[%s1560_s7 + $0x70] sm:$0xff] }
  0x2e   : > { %v1057_v20 = vld [vmem:[%s1560_s7 + $0x18] sm:$0xff]  ;;  %v1589_v26 = vld [vmem:[%s1684_s2] ss:$0 sm:$0xff]  ;;  %p1354_p4 = pnand %p1353_p1, %p1531_p5  ;;  %p1359_p13 = por %p1358_p12, %p1357_p10 }
  0x2f   : > { %v1061_v21 = vld [vmem:[%s1560_s7 + $0x38] sm:$0xff] }
  0x30   : > { %522 = vmatpush.bf16.msra.mxu0 %v1075_v2  ;;  %1180 = vmatpush.bf16.msra.mxu1 %v1075_v2  ;;  %v1065_v22 = vld [vmem:[%s1560_s7 + $0x58] sm:$0xff]  ;;  %p1355_p8 = pneg %p1354_p4 }
  0x31   : > { %1181 = vmatpush.bf16.msra.mxu2 %v1075_v2  ;;  %1182 = vmatpush.bf16.msra.mxu3 %v1075_v2  ;;  %v1069_v23 = vld [vmem:[%s1560_s7 + $0x78] sm:$0xff] }
  0x32   : > { %p1360_p0 = pnand %p1359_p13, %p1355_p8 }
  0x34   : > { %523 = vmatpush.bf16.msra.mxu0 %v1074_v3  ;;  %1183 = vmatpush.bf16.msra.mxu1 %v1074_v3 }
  0x35   : > { %1184 = vmatpush.bf16.msra.mxu2 %v1074_v3  ;;  %1185 = vmatpush.bf16.msra.mxu3 %v1074_v3 }
  0x38   : > { %524 = vmatpush.bf16.msra.mxu0 %v1073_v4  ;;  %1186 = vmatpush.bf16.msra.mxu1 %v1073_v4 }
  0x39   : > { %1187 = vmatpush.bf16.msra.mxu2 %v1073_v4  ;;  %1188 = vmatpush.bf16.msra.mxu3 %v1073_v4 }
  0x3c   : > { %525 = vmatpush.bf16.msra.mxu0 %v1072_v5  ;;  %1189 = vmatpush.bf16.msra.mxu1 %v1072_v5 }
  0x3d   : > { %1190 = vmatpush.bf16.msra.mxu2 %v1072_v5  ;;  %1191 = vmatpush.bf16.msra.mxu3 %v1072_v5 }
  0x40   : > { %526 = vmatpush.bf16.msra.mxu0 %v1071_v6  ;;  %1192 = vmatpush.bf16.msra.mxu1 %v1071_v6 }
  0x41   : > { %1193 = vmatpush.bf16.msra.mxu2 %v1071_v6  ;;  %1194 = vmatpush.bf16.msra.mxu3 %v1071_v6 }
  0x44   : > { %527 = vmatpush.bf16.msra.mxu0 %v1070_v7  ;;  %1195 = vmatpush.bf16.msra.mxu1 %v1070_v7 }
  0x45   : > { %1196 = vmatpush.bf16.msra.mxu2 %v1070_v7  ;;  %1197 = vmatpush.bf16.msra.mxu3 %v1070_v7 }
  0x47   : > { %528 = vmatmul.bf16.vlgmr.msra.gmra.mxu0 %v1054_v8  ;;  %548 = vmatmul.bf16.vlgmr.msra.gmra.mxu1 %v1058_v9 }
  0x48   : > { %568 = vmatmul.bf16.vlgmr.msra.gmra.mxu2 %v1062_v10  ;;  %588 = vmatmul.bf16.vlgmr.msra.gmra.mxu3 %v1066_v11 }
  0x57   : > { %533 = vmatmul.bf16.gmra.mxu0 %v1055_v12  ;;  %553 = vmatmul.bf16.gmra.mxu1 %v1059_v13 }
  0x58   : > { %573 = vmatmul.bf16.gmra.mxu2 %v1063_v14  ;;  %593 = vmatmul.bf16.gmra.mxu3 %v1067_v15 }
  0x67   : > { %538 = vmatmul.bf16.gmra.mxu0 %v1056_v16  ;;  %558 = vmatmul.bf16.gmra.mxu1 %v1060_v17 }
  0x68   : > { %578 = vmatmul.bf16.gmra.mxu2 %v1064_v18  ;;  %598 = vmatmul.bf16.gmra.mxu3 %v1068_v19 }
  0x77   : > { %543 = vmatmul.bf16.gmra.mxu0 %v1057_v20  ;;  %563 = vmatmul.bf16.gmra.mxu1 %v1061_v21 }
  0x78   : > { %583 = vmatmul.bf16.gmra.mxu2 %v1065_v22  ;;  %603 = vmatmul.bf16.gmra.mxu3 %v1069_v23 }
  0xc4   : > { %v529_v24 = vpop.f32.mrf.mxu0  ;;  %v549_v25 = vpop.f32.mrf.mxu1 }
  0xc5   : > { %v712_v31 = vadd.f32 %v1589_v26, %v529_v24  ;;  %v720_v32 = vadd.f32 %v1589_v26, %v549_v25 }
  0xcb   : > { %v569_v27 = vpop.f32.mrf.mxu2  ;;  %v589_v28 = vpop.f32.mrf.mxu3 }
  0xcc   : > { %v531_v29 = vpop.f32.mrf.mxu0  ;;  %v551_v30 = vpop.f32.mrf.mxu1  ;;  %v728_v39 = vadd.f32 %v1589_v26, %v569_v27  ;;  %v736_v40 = vadd.f32 %v1589_v26, %v589_v28 }
  0xcd   : > { %v713_v33 = vadd.f32 %v1589_v26, %v531_v29  ;;  %v721_v34 = vadd.f32 %v1589_v26, %v551_v30 }
  0xcf   : > { %v1082_v35 = vpack.c.bf16 %v713_v33, %v712_v31  ;;  %v1102_v36 = vpack.c.bf16 %v721_v34, %v720_v32 }
  0xd1   : > { %1083 = vst [vmem:[%s1597_s22] sm:$0xff] %v1082_v35  }
  0xd2   : > { %1162 = vst [vmem:[%s1597_s22 + $0x20] sm:$0xff] %v1102_v36  }
  0xd3   : > { %v571_v37 = vpop.f32.mrf.mxu2  ;;  %v591_v38 = vpop.f32.mrf.mxu3 }
  0xd4   : > { %v729_v41 = vadd.f32 %v1589_v26, %v571_v37  ;;  %v737_v42 = vadd.f32 %v1589_v26, %v591_v38  ;;  %v534_v43 = vpop.f32.mrf.mxu0  ;;  %v554_v44 = vpop.f32.mrf.mxu1 }
  0xd5   : > { %v714_v51 = vadd.f32 %v1589_v26, %v534_v43  ;;  %v722_v52 = vadd.f32 %v1589_v26, %v554_v44 }
  0xd6   : > { %v1122_v45 = vpack.c.bf16 %v729_v41, %v728_v39  ;;  %v1142_v46 = vpack.c.bf16 %v737_v42, %v736_v40 }
  0xd8   : > { %1166 = vst [vmem:[%s1597_s22 + $0x40] sm:$0xff] %v1122_v45  }
  0xd9   : > { %1170 = vst [vmem:[%s1597_s22 + $0x60] sm:$0xff] %v1142_v46  }
  0xdb   : > { %v574_v47 = vpop.f32.mrf.mxu2  ;;  %v594_v48 = vpop.f32.mrf.mxu3 }
  0xdc   : > { %v536_v49 = vpop.f32.mrf.mxu0  ;;  %v556_v50 = vpop.f32.mrf.mxu1  ;;  %v730_v59 = vadd.f32 %v1589_v26, %v574_v47  ;;  %v738_v60 = vadd.f32 %v1589_v26, %v594_v48 }
  0xdd   : > { %v715_v53 = vadd.f32 %v1589_v26, %v536_v49  ;;  %v723_v54 = vadd.f32 %v1589_v26, %v556_v50 }
  0xdf   : > { %v1087_v55 = vpack.c.bf16 %v715_v53, %v714_v51  ;;  %v1107_v56 = vpack.c.bf16 %v723_v54, %v722_v52 }
  0xe1   : > { %1159 = vst [vmem:[%s1597_s22 + $0x8] sm:$0xff] %v1087_v55  }
  0xe2   : > { %1163 = vst [vmem:[%s1597_s22 + $0x28] sm:$0xff] %v1107_v56  }
  0xe3   : > { %v576_v57 = vpop.f32.mrf.mxu2  ;;  %v596_v58 = vpop.f32.mrf.mxu3 }
  0xe4   : > { %v731_v61 = vadd.f32 %v1589_v26, %v576_v57  ;;  %v739_v62 = vadd.f32 %v1589_v26, %v596_v58  ;;  %v539_v63 = vpop.f32.mrf.mxu0  ;;  %v559_v0 = vpop.f32.mrf.mxu1 }
  0xe5   : > { %v716_v7 = vadd.f32 %v1589_v26, %v539_v63  ;;  %v724_v8 = vadd.f32 %v1589_v26, %v559_v0 }
  0xe6   : > { %v1127_v1 = vpack.c.bf16 %v731_v61, %v730_v59  ;;  %v1147_v2 = vpack.c.bf16 %v739_v62, %v738_v60 }
  0xe8   : > { %1167 = vst [vmem:[%s1597_s22 + $0x48] sm:$0xff] %v1127_v1  }
  0xe9   : > { %1171 = vst [vmem:[%s1597_s22 + $0x68] sm:$0xff] %v1147_v2  }
  0xeb   : > { %v579_v3 = vpop.f32.mrf.mxu2  ;;  %v599_v4 = vpop.f32.mrf.mxu3 }
  0xec   : > { %v541_v5 = vpop.f32.mrf.mxu0  ;;  %v561_v6 = vpop.f32.mrf.mxu1  ;;  %v732_v15 = vadd.f32 %v1589_v26, %v579_v3  ;;  %v740_v16 = vadd.f32 %v1589_v26, %v599_v4 }
  0xed   : > { %v717_v9 = vadd.f32 %v1589_v26, %v541_v5  ;;  %v725_v10 = vadd.f32 %v1589_v26, %v561_v6 }
  0xef   : > { %v1092_v11 = vpack.c.bf16 %v717_v9, %v716_v7  ;;  %v1112_v12 = vpack.c.bf16 %v725_v10, %v724_v8 }
  0xf1   : > { %1160 = vst [vmem:[%s1597_s22 + $0x10] sm:$0xff] %v1092_v11  }
  0xf2   : > { %1164 = vst [vmem:[%s1597_s22 + $0x30] sm:$0xff] %v1112_v12  }
  0xf3   : > { %v581_v13 = vpop.f32.mrf.mxu2  ;;  %v601_v14 = vpop.f32.mrf.mxu3 }
  0xf4   : > { %v733_v17 = vadd.f32 %v1589_v26, %v581_v13  ;;  %v741_v18 = vadd.f32 %v1589_v26, %v601_v14  ;;  %v544_v19 = vpop.f32.mrf.mxu0  ;;  %v564_v20 = vpop.f32.mrf.mxu1 }
  0xf5   : > { %v718_v28 = vadd.f32 %v1589_v26, %v544_v19  ;;  %v726_v29 = vadd.f32 %v1589_v26, %v564_v20 }
  0xf6   : > { %v1132_v21 = vpack.c.bf16 %v733_v17, %v732_v15  ;;  %v1152_v22 = vpack.c.bf16 %v741_v18, %v740_v16 }
  0xf8   : > { %1168 = vst [vmem:[%s1597_s22 + $0x50] sm:$0xff] %v1132_v21  }
  0xf9   : > { %1172 = vst [vmem:[%s1597_s22 + $0x70] sm:$0xff] %v1152_v22  }
  0xfb   : > { %v584_v23 = vpop.f32.mrf.mxu2  ;;  %v604_v24 = vpop.f32.mrf.mxu3 }
  0xfc   : > { %v546_v25 = vpop.f32.mrf.mxu0  ;;  %v566_v27 = vpop.f32.mrf.mxu1  ;;  %v734_v36 = vadd.f32 %v1589_v26, %v584_v23  ;;  %v742_v37 = vadd.f32 %v1589_v26, %v604_v24 }
  0xfd   : > { %v719_v30 = vadd.f32 %v1589_v26, %v546_v25  ;;  %v727_v31 = vadd.f32 %v1589_v26, %v566_v27 }
  0xff   : > { %v1097_v32 = vpack.c.bf16 %v719_v30, %v718_v28  ;;  %v1117_v33 = vpack.c.bf16 %v727_v31, %v726_v29 }
 0x101   : > { %1161 = vst [vmem:[%s1597_s22 + $0x18] sm:$0xff] %v1097_v32  }
 0x102   : > { %1165 = vst [vmem:[%s1597_s22 + $0x38] sm:$0xff] %v1117_v33  }
 0x103   : > { %v586_v34 = vpop.f32.mrf.mxu2  ;;  %v606_v35 = vpop.f32.mrf.mxu3 }
 0x104   : > { %v735_v38 = vadd.f32 %v1589_v26, %v586_v34  ;;  %v743_v39 = vadd.f32 %v1589_v26, %v606_v35 }
 0x106   : > { %v1137_v40 = vpack.c.bf16 %v735_v38, %v734_v36  ;;  %v1157_v41 = vpack.c.bf16 %v743_v39, %v742_v37 }
 0x108   : > { %1169 = vst [vmem:[%s1597_s22 + $0x58] sm:$0xff] %v1137_v40  }
 0x109   : > { %1173 = vst [vmem:[%s1597_s22 + $0x78] sm:$0xff] %v1157_v41  }
 0x10a   : > { %1363 = shalt.err (!%p1360_p0)
}
 0x10b   : > { %s1427_s6 = smov 64   ;;  %s1428_s7 = smov 4  }
 0x10c   : > { %1204 = dma.vmem_to_hbm [thread:$0]  (%p1531_p5), %s823_s19, 2048, %s825_s24, %s809_s15, %s1427_s6, %s1427_s6, %s1428_s7  }
 0x10d PF: > { %s839_s1 = sand.u32 1, %s1402_s12   ;;  %p1215_p3 = pnand %p944_p11, %p1498_p6 }
 0x10e   : > { %s840_s20 = scalar_lea.sflag [#allocation5], %s839_s1 }
 0x10f   : > { %p1216_p7 = pneg %p1215_p3 }
 0x111   : > { %1397 = dma.done.wait (%p1216_p7), %s840_s20, 2048  }
 0x112   : > { %1399 = vsyncadd (%p1216_p7), %s840_s20, 4294965248  ;;  %s20_s17 = sadd.s32 1, %s1422_s17   ;;  %s1697_s12 = smov %s1406_s13 }
 0x113   : > { %p17_p9 = scmp.ge.s32.totalorder %s20_s17, 4   ;;  %s1698_s13 = smov %s1410_s14 }
 0x114   : > { %s1699_s14 = smov %s1540_s18  ;;  %s1700_s15 = smov %s1418_s16 }
 0x115   : > { %s1701_s16 = smov %s1703_s5  ;;  %19 = sbr.rel (!%p17_p9) target bundleno = 9 (0x9), region = 93 }
 0x11a   :  { %846 = vsyncpa [#allocation4], 1 }
 0x11b   :  { %848 = vsyncpa [#allocation4 + $0x1], 1 }
 0x11c   :  { %849 = vsyncpa [#allocation7], 1 }
 0x11d   :  { %850 = vsyncpa [#allocation5], 1 }
 0x11e   :  { %852 = vsyncpa [#allocation5 + $0x1], 1 }

</bundles_post_ra>
